<compile_context>
chip_gen: v5e
topology: v5e:2x2
jax: 0.10.0
libtpu: 0.0.40
codegen_flags: <defaults>
</compile_context>

<pallas_src>
import jax
import jax.numpy as jnp
from jax.experimental import pallas as pl
from jax.experimental.pallas import tpu as pltpu


def _hs(x):
    """HardSigmoid: relu6(x + 3) / 6 == clamp(x + 3, 0, 6) * (1/6)."""
    return jnp.clip(x + 3.0, 0.0, 6.0) * (1.0 / 6.0)


def _hardsigmoid_kernel(x_ref, o_ref):
    o_ref[...] = _hs(x_ref[...])


def _pick_width(n: int) -> int:
    """Widest lane-dense last dim (multiple of 128) dividing n with rows >= 8."""
    for w in (4096, 2048, 1024, 512, 256, 128):
        if n % w == 0 and (n // w) >= 8:
            return w
    for w in (4096, 2048, 1024, 512, 256, 128):  # fallback: rows may be < 8
        if n % w == 0:
            return w
    return 0


def _tile_rows(rows: int, w: int, itemsize: int, max_block_bytes: int) -> int:
    """Pick block rows: byte-budgeted, dtype-packing aligned, evenly split."""
    sub = max(8, 32 // itemsize)                      # 8 f32 / 16 bf16 / 32 int8
    max_block_elems = max(1, max_block_bytes // itemsize)
    tile_r = min(rows, max(sub, max_block_elems // w))
    if tile_r >= rows:
        return rows                                   # single whole-slab block
    tile_r = max(sub, (tile_r // sub) * sub)          # packing granularity
    if tile_r >= rows:
        return rows
    # Balance into an even number of near-equal blocks (feeds both v7x TCs).
    nblk = pl.cdiv(rows, tile_r)
    if nblk % 2:
        nblk += 1
    tile_r = pl.cdiv(rows, nblk)
    tile_r = pl.cdiv(tile_r, sub) * sub               # keep sublane alignment
    return min(tile_r, rows)


def _hardsigmoid_pallas(flat: jax.Array, max_block_bytes: int) -> jax.Array:
    """Tiled/pipelined path. `flat` is 1-D with size a multiple of 128."""
    n = flat.shape[0]
    dtype = flat.dtype
    itemsize = jnp.dtype(dtype).itemsize

    w = _pick_width(n)
    if w == 0:  # defensive; callers guarantee n % 128 == 0
        return _hs(flat)
    rows = n // w
    tile_r = _tile_rows(rows, w, itemsize, max_block_bytes)
    slab = flat.reshape(rows, w)

    grid = (pl.cdiv(rows, tile_r),)                   # partial last block OK
    block_bytes = tile_r * w * itemsize
    # 2x in + 2x out double buffers + headroom; clamp to [32 MiB, 48 MiB]
    # (48 MiB keeps margin inside v7x's 64 MiB physical VMEM).
    vmem_limit = int(max(32 << 20, min(48 << 20, 4 * block_bytes + (4 << 20))))

    out = pl.pallas_call(
        _hardsigmoid_kernel,
        out_shape=jax.ShapeDtypeStruct((rows, w), dtype),
        grid=grid,
        in_specs=[pl.BlockSpec((tile_r, w), lambda i: (i, 0))],
        out_specs=pl.BlockSpec((tile_r, w), lambda i: (i, 0)),
        compiler_params=pltpu.CompilerParams(
            dimension_semantics=("parallel",),
            vmem_limit_bytes=vmem_limit,
        ),
    )(slab)
    return out.reshape(-1)


def hardsigmoid(x: jax.Array, *, max_block_bytes: int = 8 << 20,
                min_pallas_elems: int = 4096) -> jax.Array:
    """HardSigmoid matching torch F.relu6(x + 3) / 6, any shape / float dtype."""
    orig_shape = x.shape
    n = x.size
    if n == 0:
        return x
    if n < min_pallas_elems:
        # A few vregs or less: kernel launch cost dominates; let XLA fuse it.
        return _hs(x)

    flat = x.reshape(-1)
    if n % 128 != 0:
        # Ragged size: pipelined kernel on the 8x128-aligned bulk, jnp tail.
        # TODO(synk): a masked pltpu.store on a padded last block would avoid
        # the final concatenate's extra HBM pass for large ragged inputs.
        bulk_n = (n // 1024) * 1024
        tail_out = _hs(flat[bulk_n:])
        if bulk_n < min_pallas_elems:
            bulk_out = _hs(flat[:bulk_n])
        else:
            bulk_out = _hardsigmoid_pallas(flat[:bulk_n], max_block_bytes)
        return jnp.concatenate([bulk_out, tail_out]).reshape(orig_shape)

    return _hardsigmoid_pallas(flat, max_block_bytes).reshape(orig_shape)


if __name__ == "__main__":
    key = jax.random.PRNGKey(0)
    k1, k2, k3, k4 = jax.random.split(key, 4)

    # 1) Module-sized NCHW input (2,4,16,16): tiny -> fused jnp fast path.
    x_small = jax.random.normal(k1, (2, 4, 16, 16), dtype=jnp.float32) * 4.0
    y_small = jax.block_until_ready(hardsigmoid(x_small))
    assert y_small.shape == x_small.shape and y_small.dtype == x_small.dtype
    assert jnp.allclose(y_small, _hs(x_small), atol=1e-6, rtol=1e-6)

    # 2) f32 input through the Pallas tiled path (single lane-dense block).
    x_f32 = jax.random.normal(k2, (4, 8, 32, 128), dtype=jnp.float32) * 4.0
    y_f32 = jax.block_until_ready(hardsigmoid(x_f32))
    assert y_f32.shape == x_f32.shape and y_f32.dtype == x_f32.dtype
    assert jnp.allclose(y_f32, _hs(x_f32), atol=1e-6, rtol=1e-6)

    # 3) Same data, tiny forced block budget -> multi-block balanced grid.
    y_multi = jax.block_until_ready(hardsigmoid(x_f32, max_block_bytes=64 << 10))
    assert jnp.allclose(y_multi, _hs(x_f32), atol=1e-6, rtol=1e-6)

    # 4) bf16 input: exercises byte-based sizing + 16-row sublane packing.
    x_bf16 = (jax.random.normal(k3, (2, 16, 32, 128), dtype=jnp.float32) * 4.0
              ).astype(jnp.bfloat16)
    y_bf16 = jax.block_until_ready(hardsigmoid(x_bf16, max_block_bytes=64 << 10))
    assert y_bf16.shape == x_bf16.shape and y_bf16.dtype == jnp.bfloat16
    assert jnp.allclose(y_bf16.astype(jnp.float32),
                        _hs(x_bf16).astype(jnp.float32), atol=2e-3, rtol=2e-3)

    # 5) Ragged total size: aligned bulk through Pallas + jnp tail.
    x_rag = jax.random.normal(k4, (3, 5, 31, 33), dtype=jnp.float32) * 4.0
    y_rag = jax.block_until_ready(hardsigmoid(x_rag))
    assert y_rag.shape == x_rag.shape and y_rag.dtype == x_rag.dtype
    assert jnp.allclose(y_rag, _hs(x_rag), atol=1e-6, rtol=1e-6)

    print("KERNEL_OK")
</pallas_src>

<mosaic_0001>
module attributes {stable_mosaic.version = 11 : i64} {
  func.func @_hardsigmoid_kernel(%arg0: i32, %arg1: memref<32x4096xf32, #tpu.memory_space<vmem>>, %arg2: memref<32x4096xf32, #tpu.memory_space<vmem>>) attributes {dimension_semantics = [#tpu.dimension_semantics<parallel>], iteration_bounds = array<i64: 1>, scalar_prefetch = 0 : i64, scratch_operands = 0 : i64, tpu.core_type = #tpu.core_type<tc>, window_params = [{transform_indices = @transform_0, window_bounds = array<i64: 32, 4096>}, {transform_indices = @transform_1, window_bounds = array<i64: 32, 4096>}]} {
    %c0 = arith.constant 0 : index
    %c0_0 = arith.constant 0 : index
    %0 = vector.load %arg1[%c0, %c0_0] : memref<32x4096xf32, #tpu.memory_space<vmem>>, vector<32x4096xf32>
    %cst = arith.constant 3.000000e+00 : f32
    %1 = vector.broadcast %cst : f32 to vector<32x4096xf32>
    %2 = arith.addf %0, %1 : vector<32x4096xf32>
    %cst_1 = arith.constant 0.000000e+00 : f32
    %cst_2 = arith.constant 6.000000e+00 : f32
    %3 = vector.broadcast %cst_1 : f32 to vector<32x4096xf32>
    %4 = arith.maximumf %3, %2 : vector<32x4096xf32>
    %5 = vector.broadcast %cst_2 : f32 to vector<32x4096xf32>
    %6 = arith.minimumf %5, %4 : vector<32x4096xf32>
    %cst_3 = arith.constant 0.166666672 : f32
    %7 = vector.broadcast %cst_3 : f32 to vector<32x4096xf32>
    %8 = arith.mulf %6, %7 : vector<32x4096xf32>
    %c0_4 = arith.constant 0 : index
    %c0_5 = arith.constant 0 : index
    %9 = vector.load %arg2[%c0_4, %c0_5] : memref<32x4096xf32, #tpu.memory_space<vmem>>, vector<32x4096xf32>
    tpu.vector_store %arg2[%c0_4, %c0_5], %8 {strides = array<i32>} : memref<32x4096xf32, #tpu.memory_space<vmem>>, vector<32x4096xf32>,
    return
  }
  func.func @transform_0(%arg0: i32) -> (i32, i32) {
    %c0_i32 = arith.constant 0 : i32
    %c0_i32_0 = arith.constant 0 : i32
    return %arg0, %c0_i32 : i32, i32
  }
  func.func @transform_1(%arg0: i32) -> (i32, i32) {
    %c0_i32 = arith.constant 0 : i32
    %c0_i32_0 = arith.constant 0 : i32
    return %arg0, %c0_i32 : i32, i32
  }
}

</mosaic_0001>

<bundles_post_ra>
// kernel: tpu_custom_call.1
= control target key start
LH: loop header
LB: loop body
LE: loop exit
PB: predicated region body
PF: predicated region fallthrough
CT: control target
= control target key end

     0   :  { %6 = vsyncpa [#allocation3], 0  ;;  %s894_s0 = inlined_call_operand.hbm [shape: f32[32,4096], index: 0, kind: input, shape index: {}]   ;;  %s895_s1 = inlined_call_operand.hbm [shape: f32[32,4096], index: 1, kind: output, shape index: {}]  }
   0x1   :  { %7 = vsyncpa [#allocation4], 0  ;;  %s12_s8 = sshll.u32 %s894_s0, 4  ;;  %s868_s9 = smov [#allocation2]   ;;  %s13_s8 = int_to_ptr.hbm [resolvable:$true] %s12_s8 }
   0x2   :  { %s14_s10 = sshll.u32 %s868_s9, 4  ;;  %s869_s11 = smov 4096   ;;  %s15_s10 = int_to_ptr.vmem [resolvable:$true] %s14_s10 }
   0x3   :  { %s870_s12 = smov 256  }
   0x4   :  { %20 = dma.hbm_to_vmem [thread:$0]  %s13_s8, 16384, %s15_s10, [#allocation3], %s869_s11, %s869_s11, %s870_s12  }
   0x5   :  { %864 = dma.done.wait [#allocation3], 16384  }
   0x6   :  { %865 = vsyncadd [#allocation3], 4294950912  ;;  %v25_v0 = vld [vmem:[#allocation2] sm:$0xff]  ;;  %v26_v1 = vld [vmem:[#allocation2 + $0x8] sm:$0xff]  ;;  %s871_s0 = smov [#allocation5]   ;;  %s799_s16 = sshll.u32 %s895_s1, 4  ;;  %s800_s16 = int_to_ptr.hbm [resolvable:$true] %s799_s16 }
   0x7   :  { %v27_v2 = vld [vmem:[#allocation2 + $0x10] sm:$0xff]  ;;  %v153_v3 = vadd.f32 3.0, %v25_v0  ;;  %v154_v4 = vadd.f32 3.0, %v26_v1  ;;  %v28_v6 = vld [vmem:[#allocation2 + $0x18] sm:$0xff]  ;;  %v29_v7 = vld [vmem:[#allocation2 + $0x20] sm:$0xff]  ;;  %s797_s13 = sshll.u32 %s871_s0, 4  ;;  %s798_s13 = int_to_ptr.vmem [resolvable:$true] %s797_s13 }
   0x8   :  { %v155_v5 = vadd.f32 3.0, %v27_v2  ;;  %v30_v8 = vld [vmem:[#allocation2 + $0x28] sm:$0xff]  ;;  %v156_v9 = vadd.f32 3.0, %v28_v6  ;;  %v157_v10 = vadd.f32 3.0, %v29_v7  ;;  %v31_v12 = vld [vmem:[#allocation2 + $0x30] sm:$0xff]  ;;  %v32_v13 = vld [vmem:[#allocation2 + $0x38] sm:$0xff] }
   0x9   :  { %v158_v11 = vadd.f32 3.0, %v30_v8  ;;  %v281_v14 = vmax.f32 %v153_v3, 0.0  ;;  %v282_v15 = vmax.f32 %v154_v4, 0.0  ;;  %v159_v17 = vadd.f32 3.0, %v31_v12  ;;  %v33_v22 = vld [vmem:[#allocation2 + $0x40] sm:$0xff]  ;;  %v34_v23 = vld [vmem:[#allocation2 + $0x48] sm:$0xff] }
   0xa   :  { %v283_v16 = vmax.f32 %v155_v5, 0.0  ;;  %v284_v18 = vmax.f32 %v156_v9, 0.0  ;;  %v285_v19 = vmax.f32 %v157_v10, 0.0  ;;  %v160_v21 = vadd.f32 3.0, %v32_v13  ;;  %v35_v28 = vld [vmem:[#allocation2 + $0x50] sm:$0xff]  ;;  %v36_v29 = vld [vmem:[#allocation2 + $0x58] sm:$0xff] }
   0xb   :  { %v286_v20 = vmax.f32 %v158_v11, 0.0  ;;  %v409_v24 = vmin.f32 %v281_v14, 6.0  ;;  %v410_v25 = vmin.f32 %v282_v15, 6.0  ;;  %v287_v27 = vmax.f32 %v159_v17, 0.0  ;;  %v37_v34 = vld [vmem:[#allocation2 + $0x60] sm:$0xff]  ;;  %v38_v35 = vld [vmem:[#allocation2 + $0x68] sm:$0xff] }
   0xc   :  { %v411_v26 = vmin.f32 %v283_v16, 6.0  ;;  %v412_v30 = vmin.f32 %v284_v18, 6.0  ;;  %v413_v31 = vmin.f32 %v285_v19, 6.0  ;;  %v288_v33 = vmax.f32 %v160_v21, 0.0  ;;  %v39_v46 = vld [vmem:[#allocation2 + $0x70] sm:$0xff]  ;;  %v40_v51 = vld [vmem:[#allocation2 + $0x78] sm:$0xff] }
   0xd   :  { %v414_v32 = vmin.f32 %v286_v20, 6.0  ;;  %v537_v36 = vmul.f32 0.16666667, %v409_v24  ;;  %v538_v37 = vmul.f32 0.16666667, %v410_v25  ;;  %v415_v42 = vmin.f32 %v287_v27, 6.0 }
   0xe   :  { %v539_v38 = vmul.f32 0.16666667, %v411_v26  ;;  %v540_v39 = vmul.f32 0.16666667, %v412_v30  ;;  %v541_v40 = vmul.f32 0.16666667, %v413_v31 }
   0xf   :  { %v542_v41 = vmul.f32 0.16666667, %v414_v32  ;;  %665 = vst [vmem:[#allocation5] sm:$0xff] %v537_v36  ;;  %v416_v43 = vmin.f32 %v288_v33, 6.0  ;;  %v161_v44 = vadd.f32 3.0, %v33_v22  ;;  %v162_v45 = vadd.f32 3.0, %v34_v23 }
  0x10   :  { %666 = vst [vmem:[#allocation5 + $0x8] sm:$0xff] %v538_v37  ;;  %v163_v47 = vadd.f32 3.0, %v35_v28  ;;  %v164_v48 = vadd.f32 3.0, %v36_v29  ;;  %v165_v49 = vadd.f32 3.0, %v37_v34  ;;  %v166_v50 = vadd.f32 3.0, %v38_v35  ;;  %v41_v59 = vld [vmem:[#allocation2 + $0x80] sm:$0xff] }
  0x11   :  { %667 = vst [vmem:[#allocation5 + $0x10] sm:$0xff] %v539_v38  ;;  %v543_v52 = vmul.f32 0.16666667, %v415_v42  ;;  %v544_v53 = vmul.f32 0.16666667, %v416_v43  ;;  %v289_v54 = vmax.f32 %v161_v44, 0.0 }
  0x12   :  { %668 = vst [vmem:[#allocation5 + $0x18] sm:$0xff] %v540_v39  ;;  %v290_v55 = vmax.f32 %v162_v45, 0.0  ;;  %v291_v56 = vmax.f32 %v163_v47, 0.0  ;;  %v292_v57 = vmax.f32 %v164_v48, 0.0  ;;  %v293_v58 = vmax.f32 %v165_v49, 0.0  ;;  %v42_v0 = vld [vmem:[#allocation2 + $0x88] sm:$0xff] }
  0x13   :  { %669 = vst [vmem:[#allocation5 + $0x20] sm:$0xff] %v541_v40  ;;  %v417_v60 = vmin.f32 %v289_v54, 6.0  ;;  %v294_v61 = vmax.f32 %v166_v50, 0.0  ;;  %v167_v62 = vadd.f32 3.0, %v39_v46  ;;  %v168_v63 = vadd.f32 3.0, %v40_v51  ;;  %v43_v5 = vld [vmem:[#allocation2 + $0x90] sm:$0xff] }
  0x14   :  { %670 = vst [vmem:[#allocation5 + $0x28] sm:$0xff] %v542_v41  ;;  %v418_v1 = vmin.f32 %v290_v55, 6.0  ;;  %v419_v2 = vmin.f32 %v291_v56, 6.0  ;;  %v420_v3 = vmin.f32 %v292_v57, 6.0  ;;  %v421_v4 = vmin.f32 %v293_v58, 6.0  ;;  %v44_v6 = vld [vmem:[#allocation2 + $0x98] sm:$0xff] }
  0x15   :  { %v45_v7 = vld [vmem:[#allocation2 + $0xa0] sm:$0xff]  ;;  %671 = vst [vmem:[#allocation5 + $0x30] sm:$0xff] %v543_v52  ;;  %v545_v8 = vmul.f32 0.16666667, %v417_v60  ;;  %v422_v9 = vmin.f32 %v294_v61, 6.0  ;;  %v295_v10 = vmax.f32 %v167_v62, 0.0 }
  0x16   :  { %v296_v11 = vmax.f32 %v168_v63, 0.0  ;;  %v46_v12 = vld [vmem:[#allocation2 + $0xa8] sm:$0xff]  ;;  %672 = vst [vmem:[#allocation5 + $0x38] sm:$0xff] %v544_v53  ;;  %v546_v13 = vmul.f32 0.16666667, %v418_v1  ;;  %v169_v15 = vadd.f32 3.0, %v41_v59 }
  0x17   :  { %v547_v14 = vmul.f32 0.16666667, %v419_v2  ;;  %673 = vst [vmem:[#allocation5 + $0x40] sm:$0xff] %v545_v8  ;;  %v548_v16 = vmul.f32 0.16666667, %v420_v3  ;;  %v423_v18 = vmin.f32 %v295_v10, 6.0 }
  0x18   :  { %v549_v17 = vmul.f32 0.16666667, %v421_v4  ;;  %674 = vst [vmem:[#allocation5 + $0x48] sm:$0xff] %v546_v13  ;;  %v550_v19 = vmul.f32 0.16666667, %v422_v9  ;;  %v424_v20 = vmin.f32 %v296_v11, 6.0 }
  0x19   :  { %v297_v21 = vmax.f32 %v169_v15, 0.0  ;;  %v170_v22 = vadd.f32 3.0, %v42_v0  ;;  %675 = vst [vmem:[#allocation5 + $0x50] sm:$0xff] %v547_v14  ;;  %v551_v23 = vmul.f32 0.16666667, %v423_v18  ;;  %v171_v24 = vadd.f32 3.0, %v43_v5 }
  0x1a   :  { %v172_v25 = vadd.f32 3.0, %v44_v6  ;;  %v173_v26 = vadd.f32 3.0, %v45_v7  ;;  %676 = vst [vmem:[#allocation5 + $0x58] sm:$0xff] %v548_v16  ;;  %v552_v27 = vmul.f32 0.16666667, %v424_v20  ;;  %v174_v30 = vadd.f32 3.0, %v46_v12 }
  0x1b   :  { %v425_v28 = vmin.f32 %v297_v21, 6.0  ;;  %v298_v29 = vmax.f32 %v170_v22, 0.0  ;;  %677 = vst [vmem:[#allocation5 + $0x60] sm:$0xff] %v549_v17  ;;  %v299_v31 = vmax.f32 %v171_v24, 0.0  ;;  %v47_v34 = vld [vmem:[#allocation2 + $0xb0] sm:$0xff]  ;;  %v48_v35 = vld [vmem:[#allocation2 + $0xb8] sm:$0xff] }
  0x1c   :  { %v300_v32 = vmax.f32 %v172_v25, 0.0  ;;  %v301_v33 = vmax.f32 %v173_v26, 0.0  ;;  %678 = vst [vmem:[#allocation5 + $0x68] sm:$0xff] %v550_v19  ;;  %v302_v38 = vmax.f32 %v174_v30, 0.0  ;;  %v175_v39 = vadd.f32 3.0, %v47_v34  ;;  %v49_v44 = vld [vmem:[#allocation2 + $0xc0] sm:$0xff] }
  0x1d   :  { %v553_v36 = vmul.f32 0.16666667, %v425_v28  ;;  %v426_v37 = vmin.f32 %v298_v29, 6.0  ;;  %679 = vst [vmem:[#allocation5 + $0x70] sm:$0xff] %v551_v23  ;;  %v427_v40 = vmin.f32 %v299_v31, 6.0  ;;  %v176_v43 = vadd.f32 3.0, %v48_v35 }
  0x1e   :  { %v428_v41 = vmin.f32 %v300_v32, 6.0  ;;  %v429_v42 = vmin.f32 %v301_v33, 6.0  ;;  %680 = vst [vmem:[#allocation5 + $0x78] sm:$0xff] %v552_v27  ;;  %v430_v46 = vmin.f32 %v302_v38, 6.0  ;;  %v303_v47 = vmax.f32 %v175_v39, 0.0  ;;  %v50_v57 = vld [vmem:[#allocation2 + $0xc8] sm:$0xff] }
  0x1f   :  { %v554_v45 = vmul.f32 0.16666667, %v426_v37  ;;  %v177_v48 = vadd.f32 3.0, %v49_v44  ;;  %681 = vst [vmem:[#allocation5 + $0x80] sm:$0xff] %v553_v36  ;;  %v555_v49 = vmul.f32 0.16666667, %v427_v40 }
  0x20   :  { %v556_v50 = vmul.f32 0.16666667, %v428_v41  ;;  %v304_v51 = vmax.f32 %v176_v43, 0.0  ;;  %v557_v52 = vmul.f32 0.16666667, %v429_v42  ;;  %v431_v54 = vmin.f32 %v303_v47, 6.0 }
  0x21   :  { %682 = vst [vmem:[#allocation5 + $0x88] sm:$0xff] %v554_v45  ;;  %v558_v53 = vmul.f32 0.16666667, %v430_v46  ;;  %v305_v56 = vmax.f32 %v177_v48, 0.0  ;;  %v51_v58 = vld [vmem:[#allocation2 + $0xd0] sm:$0xff]  ;;  %v52_v59 = vld [vmem:[#allocation2 + $0xd8] sm:$0xff] }
  0x22   :  { %683 = vst [vmem:[#allocation5 + $0x90] sm:$0xff] %v555_v49  ;;  %v432_v55 = vmin.f32 %v304_v51, 6.0  ;;  %v559_v60 = vmul.f32 0.16666667, %v431_v54  ;;  %v178_v61 = vadd.f32 3.0, %v50_v57  ;;  %v179_v62 = vadd.f32 3.0, %v51_v58 }
  0x23   :  { %684 = vst [vmem:[#allocation5 + $0x98] sm:$0xff] %v556_v50  ;;  %v180_v63 = vadd.f32 3.0, %v52_v59  ;;  %v433_v1 = vmin.f32 %v305_v56, 6.0  ;;  %v53_v2 = vld [vmem:[#allocation2 + $0xe0] sm:$0xff]  ;;  %v54_v3 = vld [vmem:[#allocation2 + $0xe8] sm:$0xff]  ;;  %v55_v8 = vld [vmem:[#allocation2 + $0xf0] sm:$0xff] }
  0x24   :  { %685 = vst [vmem:[#allocation5 + $0xa0] sm:$0xff] %v557_v52  ;;  %v560_v0 = vmul.f32 0.16666667, %v432_v55  ;;  %v306_v4 = vmax.f32 %v178_v61, 0.0  ;;  %v307_v5 = vmax.f32 %v179_v62, 0.0  ;;  %v181_v7 = vadd.f32 3.0, %v53_v2 }
  0x25   :  { %686 = vst [vmem:[#allocation5 + $0xa8] sm:$0xff] %v558_v53  ;;  %v308_v6 = vmax.f32 %v180_v63, 0.0  ;;  %v561_v9 = vmul.f32 0.16666667, %v433_v1  ;;  %v182_v10 = vadd.f32 3.0, %v54_v3  ;;  %v183_v11 = vadd.f32 3.0, %v55_v8 }
  0x26   :  { %687 = vst [vmem:[#allocation5 + $0xb0] sm:$0xff] %v559_v60  ;;  %v56_v12 = vld [vmem:[#allocation2 + $0xf8] sm:$0xff]  ;;  %v434_v13 = vmin.f32 %v306_v4, 6.0  ;;  %v435_v14 = vmin.f32 %v307_v5, 6.0  ;;  %v309_v16 = vmax.f32 %v181_v7, 0.0  ;;  %v57_v17 = vld [vmem:[#allocation2 + $0x100] sm:$0xff] }
  0x27   :  { %688 = vst [vmem:[#allocation5 + $0xb8] sm:$0xff] %v560_v0  ;;  %v436_v15 = vmin.f32 %v308_v6, 6.0  ;;  %v310_v18 = vmax.f32 %v182_v10, 0.0  ;;  %v311_v19 = vmax.f32 %v183_v11, 0.0  ;;  %v184_v20 = vadd.f32 3.0, %v56_v12  ;;  %v58_v22 = vld [vmem:[#allocation2 + $0x108] sm:$0xff] }
  0x28   :  { %689 = vst [vmem:[#allocation5 + $0xc0] sm:$0xff] %v561_v9  ;;  %v185_v21 = vadd.f32 3.0, %v57_v17  ;;  %v562_v23 = vmul.f32 0.16666667, %v434_v13  ;;  %v563_v24 = vmul.f32 0.16666667, %v435_v14 }
  0x29   :  { %v564_v25 = vmul.f32 0.16666667, %v436_v15  ;;  %v437_v26 = vmin.f32 %v309_v16, 6.0  ;;  %v438_v27 = vmin.f32 %v310_v18, 6.0  ;;  %v439_v28 = vmin.f32 %v311_v19, 6.0  ;;  %v59_v30 = vld [vmem:[#allocation2 + $0x110] sm:$0xff] }
  0x2a   :  { %v312_v29 = vmax.f32 %v184_v20, 0.0  ;;  %v60_v31 = vld [vmem:[#allocation2 + $0x118] sm:$0xff]  ;;  %690 = vst [vmem:[#allocation5 + $0xc8] sm:$0xff] %v562_v23  ;;  %v313_v32 = vmax.f32 %v185_v21, 0.0  ;;  %v186_v33 = vadd.f32 3.0, %v58_v22  ;;  %v187_v34 = vadd.f32 3.0, %v59_v30 }
  0x2b   :  { %v188_v35 = vadd.f32 3.0, %v60_v31  ;;  %v61_v36 = vld [vmem:[#allocation2 + $0x120] sm:$0xff]  ;;  %691 = vst [vmem:[#allocation5 + $0xd0] sm:$0xff] %v563_v24  ;;  %v565_v37 = vmul.f32 0.16666667, %v437_v26  ;;  %v62_v47 = vld [vmem:[#allocation2 + $0x128] sm:$0xff] }
  0x2c   :  { %v566_v38 = vmul.f32 0.16666667, %v438_v27  ;;  %v440_v39 = vmin.f32 %v312_v29, 6.0  ;;  %692 = vst [vmem:[#allocation5 + $0xd8] sm:$0xff] %v564_v25  ;;  %v567_v40 = vmul.f32 0.16666667, %v439_v28 }
  0x2d   :  { %v441_v41 = vmin.f32 %v313_v32, 6.0  ;;  %v314_v42 = vmax.f32 %v186_v33, 0.0  ;;  %v315_v43 = vmax.f32 %v187_v34, 0.0  ;;  %693 = vst [vmem:[#allocation5 + $0xe0] sm:$0xff] %v565_v37  ;;  %v316_v45 = vmax.f32 %v188_v35, 0.0  ;;  %v63_v54 = vld [vmem:[#allocation2 + $0x130] sm:$0xff] }
  0x2e   :  { %v568_v44 = vmul.f32 0.16666667, %v440_v39  ;;  %v189_v46 = vadd.f32 3.0, %v61_v36  ;;  %694 = vst [vmem:[#allocation5 + $0xe8] sm:$0xff] %v566_v38  ;;  %v190_v51 = vadd.f32 3.0, %v62_v47  ;;  %v64_v55 = vld [vmem:[#allocation2 + $0x138] sm:$0xff] }
  0x2f   :  { %v569_v48 = vmul.f32 0.16666667, %v441_v41  ;;  %v442_v49 = vmin.f32 %v314_v42, 6.0  ;;  %v443_v50 = vmin.f32 %v315_v43, 6.0  ;;  %695 = vst [vmem:[#allocation5 + $0xf0] sm:$0xff] %v567_v40  ;;  %v444_v52 = vmin.f32 %v316_v45, 6.0 }
  0x30   :  { %v317_v53 = vmax.f32 %v189_v46, 0.0  ;;  %v65_v56 = vld [vmem:[#allocation2 + $0x140] sm:$0xff]  ;;  %696 = vst [vmem:[#allocation5 + $0xf8] sm:$0xff] %v568_v44  ;;  %v318_v59 = vmax.f32 %v190_v51, 0.0  ;;  %v191_v62 = vadd.f32 3.0, %v63_v54  ;;  %v192_v63 = vadd.f32 3.0, %v64_v55 }
  0x31   :  { %v570_v57 = vmul.f32 0.16666667, %v442_v49  ;;  %v571_v58 = vmul.f32 0.16666667, %v443_v50  ;;  %697 = vst [vmem:[#allocation5 + $0x100] sm:$0xff] %v569_v48  ;;  %v193_v1 = vadd.f32 3.0, %v65_v56 }
  0x32   :  { %v572_v60 = vmul.f32 0.16666667, %v444_v52  ;;  %v445_v61 = vmin.f32 %v317_v53, 6.0  ;;  %v446_v0 = vmin.f32 %v318_v59, 6.0  ;;  %v66_v2 = vld [vmem:[#allocation2 + $0x148] sm:$0xff]  ;;  %v67_v3 = vld [vmem:[#allocation2 + $0x150] sm:$0xff] }
  0x33   :  { %698 = vst [vmem:[#allocation5 + $0x108] sm:$0xff] %v570_v57  ;;  %v68_v4 = vld [vmem:[#allocation2 + $0x158] sm:$0xff]  ;;  %v319_v6 = vmax.f32 %v191_v62, 0.0  ;;  %v320_v7 = vmax.f32 %v192_v63, 0.0  ;;  %v194_v8 = vadd.f32 3.0, %v66_v2  ;;  %v321_v10 = vmax.f32 %v193_v1, 0.0 }
  0x34   :  { %699 = vst [vmem:[#allocation5 + $0x110] sm:$0xff] %v571_v58  ;;  %v573_v5 = vmul.f32 0.16666667, %v445_v61  ;;  %v574_v9 = vmul.f32 0.16666667, %v446_v0  ;;  %v195_v11 = vadd.f32 3.0, %v67_v3 }
  0x35   :  { %700 = vst [vmem:[#allocation5 + $0x118] sm:$0xff] %v572_v60  ;;  %v196_v12 = vadd.f32 3.0, %v68_v4  ;;  %v447_v13 = vmin.f32 %v319_v6, 6.0  ;;  %v448_v14 = vmin.f32 %v320_v7, 6.0  ;;  %v322_v15 = vmax.f32 %v194_v8, 0.0  ;;  %v69_v16 = vld [vmem:[#allocation2 + $0x160] sm:$0xff] }
  0x36   :  { %701 = vst [vmem:[#allocation5 + $0x120] sm:$0xff] %v573_v5  ;;  %v70_v17 = vld [vmem:[#allocation2 + $0x168] sm:$0xff]  ;;  %v449_v18 = vmin.f32 %v321_v10, 6.0  ;;  %v323_v19 = vmax.f32 %v195_v11, 0.0  ;;  %v197_v21 = vadd.f32 3.0, %v69_v16  ;;  %v71_v22 = vld [vmem:[#allocation2 + $0x170] sm:$0xff] }
  0x37   :  { %702 = vst [vmem:[#allocation5 + $0x128] sm:$0xff] %v574_v9  ;;  %v324_v20 = vmax.f32 %v196_v12, 0.0  ;;  %v575_v23 = vmul.f32 0.16666667, %v447_v13  ;;  %v576_v24 = vmul.f32 0.16666667, %v448_v14 }
  0x38   :  { %v450_v25 = vmin.f32 %v322_v15, 6.0  ;;  %v198_v26 = vadd.f32 3.0, %v70_v17  ;;  %v577_v27 = vmul.f32 0.16666667, %v449_v18  ;;  %v451_v28 = vmin.f32 %v323_v19, 6.0  ;;  %v72_v31 = vld [vmem:[#allocation2 + $0x178] sm:$0xff] }
  0x39   :  { %v452_v29 = vmin.f32 %v324_v20, 6.0  ;;  %v325_v30 = vmax.f32 %v197_v21, 0.0  ;;  %703 = vst [vmem:[#allocation5 + $0x130] sm:$0xff] %v575_v23  ;;  %v199_v34 = vadd.f32 3.0, %v71_v22  ;;  %v200_v35 = vadd.f32 3.0, %v72_v31  ;;  %v73_v42 = vld [vmem:[#allocation2 + $0x180] sm:$0xff] }
  0x3a   :  { %v578_v32 = vmul.f32 0.16666667, %v450_v25  ;;  %v326_v33 = vmax.f32 %v198_v26, 0.0  ;;  %704 = vst [vmem:[#allocation5 + $0x138] sm:$0xff] %v576_v24  ;;  %v579_v36 = vmul.f32 0.16666667, %v451_v28 }
  0x3b   :  { %v580_v37 = vmul.f32 0.16666667, %v452_v29  ;;  %v453_v38 = vmin.f32 %v325_v30, 6.0  ;;  %705 = vst [vmem:[#allocation5 + $0x140] sm:$0xff] %v577_v27  ;;  %v327_v40 = vmax.f32 %v199_v34, 0.0  ;;  %v328_v41 = vmax.f32 %v200_v35, 0.0 }
  0x3c   :  { %v454_v39 = vmin.f32 %v326_v33, 6.0  ;;  %v74_v43 = vld [vmem:[#allocation2 + $0x188] sm:$0xff]  ;;  %706 = vst [vmem:[#allocation5 + $0x148] sm:$0xff] %v578_v32  ;;  %v201_v45 = vadd.f32 3.0, %v73_v42  ;;  %v75_v47 = vld [vmem:[#allocation2 + $0x190] sm:$0xff]  ;;  %v76_v54 = vld [vmem:[#allocation2 + $0x198] sm:$0xff] }
  0x3d   :  { %v581_v44 = vmul.f32 0.16666667, %v453_v38  ;;  %v202_v46 = vadd.f32 3.0, %v74_v43  ;;  %707 = vst [vmem:[#allocation5 + $0x150] sm:$0xff] %v579_v36  ;;  %v455_v49 = vmin.f32 %v327_v40, 6.0  ;;  %v456_v50 = vmin.f32 %v328_v41, 6.0 }
  0x3e   :  { %v582_v48 = vmul.f32 0.16666667, %v454_v39  ;;  %v203_v51 = vadd.f32 3.0, %v75_v47  ;;  %708 = vst [vmem:[#allocation5 + $0x158] sm:$0xff] %v580_v37  ;;  %v329_v52 = vmax.f32 %v201_v45, 0.0  ;;  %v77_v55 = vld [vmem:[#allocation2 + $0x1a0] sm:$0xff] }
  0x3f   :  { %v330_v53 = vmax.f32 %v202_v46, 0.0  ;;  %v78_v56 = vld [vmem:[#allocation2 + $0x1a8] sm:$0xff]  ;;  %709 = vst [vmem:[#allocation5 + $0x160] sm:$0xff] %v581_v44  ;;  %v583_v57 = vmul.f32 0.16666667, %v455_v49  ;;  %v204_v62 = vadd.f32 3.0, %v76_v54 }
  0x40   :  { %v584_v58 = vmul.f32 0.16666667, %v456_v50  ;;  %v331_v59 = vmax.f32 %v203_v51, 0.0  ;;  %710 = vst [vmem:[#allocation5 + $0x168] sm:$0xff] %v582_v48  ;;  %v457_v60 = vmin.f32 %v329_v52, 6.0  ;;  %v205_v63 = vadd.f32 3.0, %v77_v55 }
  0x41   :  { %v458_v61 = vmin.f32 %v330_v53, 6.0  ;;  %v79_v0 = vld [vmem:[#allocation2 + $0x1b0] sm:$0xff]  ;;  %711 = vst [vmem:[#allocation5 + $0x170] sm:$0xff] %v583_v57  ;;  %v206_v2 = vadd.f32 3.0, %v78_v56  ;;  %v80_v4 = vld [vmem:[#allocation2 + $0x1b8] sm:$0xff]  ;;  %v81_v5 = vld [vmem:[#allocation2 + $0x1c0] sm:$0xff] }
  0x42   :  { %v459_v1 = vmin.f32 %v331_v59, 6.0  ;;  %v207_v3 = vadd.f32 3.0, %v79_v0  ;;  %712 = vst [vmem:[#allocation5 + $0x178] sm:$0xff] %v584_v58  ;;  %v585_v6 = vmul.f32 0.16666667, %v457_v60  ;;  %v332_v8 = vmax.f32 %v204_v62, 0.0 }
  0x43   :  { %v586_v7 = vmul.f32 0.16666667, %v458_v61  ;;  %v333_v10 = vmax.f32 %v205_v63, 0.0  ;;  %v334_v11 = vmax.f32 %v206_v2, 0.0  ;;  %v82_v13 = vld [vmem:[#allocation2 + $0x1c8] sm:$0xff]  ;;  %v208_v15 = vadd.f32 3.0, %v80_v4 }
  0x44   :  { %v587_v9 = vmul.f32 0.16666667, %v459_v1  ;;  %v335_v12 = vmax.f32 %v207_v3, 0.0  ;;  %713 = vst [vmem:[#allocation5 + $0x180] sm:$0xff] %v585_v6  ;;  %v460_v14 = vmin.f32 %v332_v8, 6.0  ;;  %v209_v16 = vadd.f32 3.0, %v81_v5 }
  0x45   :  { %v210_v17 = vadd.f32 3.0, %v82_v13  ;;  %v83_v18 = vld [vmem:[#allocation2 + $0x1d0] sm:$0xff]  ;;  %714 = vst [vmem:[#allocation5 + $0x188] sm:$0xff] %v586_v7  ;;  %v461_v19 = vmin.f32 %v333_v10, 6.0  ;;  %v462_v20 = vmin.f32 %v334_v11, 6.0  ;;  %v84_v23 = vld [vmem:[#allocation2 + $0x1d8] sm:$0xff] }
  0x46   :  { %v463_v21 = vmin.f32 %v335_v12, 6.0  ;;  %v211_v22 = vadd.f32 3.0, %v83_v18  ;;  %715 = vst [vmem:[#allocation5 + $0x190] sm:$0xff] %v587_v9  ;;  %v588_v24 = vmul.f32 0.16666667, %v460_v14  ;;  %v336_v25 = vmax.f32 %v208_v15, 0.0 }
  0x47   :  { %v337_v26 = vmax.f32 %v209_v16, 0.0  ;;  %v338_v27 = vmax.f32 %v210_v17, 0.0  ;;  %v589_v28 = vmul.f32 0.16666667, %v461_v19  ;;  %v590_v29 = vmul.f32 0.16666667, %v462_v20 }
  0x48   :  { %v591_v30 = vmul.f32 0.16666667, %v463_v21  ;;  %716 = vst [vmem:[#allocation5 + $0x198] sm:$0xff] %v588_v24  ;;  %v464_v31 = vmin.f32 %v336_v25, 6.0  ;;  %v339_v34 = vmax.f32 %v211_v22, 0.0  ;;  %v85_v35 = vld [vmem:[#allocation2 + $0x1e0] sm:$0xff] }
  0x49   :  { %v465_v32 = vmin.f32 %v337_v26, 6.0  ;;  %v466_v33 = vmin.f32 %v338_v27, 6.0  ;;  %717 = vst [vmem:[#allocation5 + $0x1a0] sm:$0xff] %v589_v28  ;;  %v212_v36 = vadd.f32 3.0, %v84_v23  ;;  %v213_v37 = vadd.f32 3.0, %v85_v35  ;;  %v86_v38 = vld [vmem:[#allocation2 + $0x1e8] sm:$0xff] }
  0x4a   :  { %v87_v39 = vld [vmem:[#allocation2 + $0x1f0] sm:$0xff]  ;;  %v88_v40 = vld [vmem:[#allocation2 + $0x1f8] sm:$0xff]  ;;  %718 = vst [vmem:[#allocation5 + $0x1a8] sm:$0xff] %v590_v29  ;;  %v592_v41 = vmul.f32 0.16666667, %v464_v31  ;;  %v467_v43 = vmin.f32 %v339_v34, 6.0 }
  0x4b   :  { %v593_v42 = vmul.f32 0.16666667, %v465_v32  ;;  %719 = vst [vmem:[#allocation5 + $0x1b0] sm:$0xff] %v591_v30  ;;  %v594_v44 = vmul.f32 0.16666667, %v466_v33  ;;  %v340_v45 = vmax.f32 %v212_v36, 0.0 }
  0x4c   :  { %v341_v46 = vmax.f32 %v213_v37, 0.0  ;;  %v214_v47 = vadd.f32 3.0, %v86_v38  ;;  %720 = vst [vmem:[#allocation5 + $0x1b8] sm:$0xff] %v592_v41  ;;  %v595_v48 = vmul.f32 0.16666667, %v467_v43  ;;  %v215_v49 = vadd.f32 3.0, %v87_v39 }
  0x4d   :  { %v216_v50 = vadd.f32 3.0, %v88_v40  ;;  %v89_v51 = vld [vmem:[#allocation2 + $0x200] sm:$0xff]  ;;  %721 = vst [vmem:[#allocation5 + $0x1c0] sm:$0xff] %v593_v42  ;;  %v468_v52 = vmin.f32 %v340_v45, 6.0  ;;  %v90_v56 = vld [vmem:[#allocation2 + $0x208] sm:$0xff]  ;;  %v91_v60 = vld [vmem:[#allocation2 + $0x210] sm:$0xff] }
  0x4e   :  { %v469_v53 = vmin.f32 %v341_v46, 6.0  ;;  %v342_v54 = vmax.f32 %v214_v47, 0.0  ;;  %v217_v55 = vadd.f32 3.0, %v89_v51  ;;  %722 = vst [vmem:[#allocation5 + $0x1c8] sm:$0xff] %v594_v44  ;;  %v343_v57 = vmax.f32 %v215_v49, 0.0  ;;  %v92_v61 = vld [vmem:[#allocation2 + $0x218] sm:$0xff] }
  0x4f   :  { %v344_v58 = vmax.f32 %v216_v50, 0.0  ;;  %v218_v59 = vadd.f32 3.0, %v90_v56  ;;  %723 = vst [vmem:[#allocation5 + $0x1d0] sm:$0xff] %v595_v48  ;;  %v596_v62 = vmul.f32 0.16666667, %v468_v52  ;;  %v93_v5 = vld [vmem:[#allocation2 + $0x220] sm:$0xff] }
  0x50   :  { %v597_v63 = vmul.f32 0.16666667, %v469_v53  ;;  %v470_v0 = vmin.f32 %v342_v54, 6.0  ;;  %v471_v1 = vmin.f32 %v343_v57, 6.0  ;;  %v345_v3 = vmax.f32 %v217_v55, 0.0  ;;  %v94_v6 = vld [vmem:[#allocation2 + $0x228] sm:$0xff] }
  0x51   :  { %v472_v2 = vmin.f32 %v344_v58, 6.0  ;;  %v346_v4 = vmax.f32 %v218_v59, 0.0  ;;  %724 = vst [vmem:[#allocation5 + $0x1d8] sm:$0xff] %v596_v62  ;;  %v219_v8 = vadd.f32 3.0, %v91_v60  ;;  %v220_v9 = vadd.f32 3.0, %v92_v61  ;;  %v95_v18 = vld [vmem:[#allocation2 + $0x230] sm:$0xff] }
  0x52   :  { %v598_v7 = vmul.f32 0.16666667, %v470_v0  ;;  %v221_v10 = vadd.f32 3.0, %v93_v5  ;;  %725 = vst [vmem:[#allocation5 + $0x1e0] sm:$0xff] %v597_v63  ;;  %v599_v11 = vmul.f32 0.16666667, %v471_v1 }
  0x53   :  { %v600_v12 = vmul.f32 0.16666667, %v472_v2  ;;  %v473_v13 = vmin.f32 %v345_v3, 6.0  ;;  %v474_v14 = vmin.f32 %v346_v4, 6.0  ;;  %v347_v15 = vmax.f32 %v219_v8, 0.0  ;;  %v96_v22 = vld [vmem:[#allocation2 + $0x238] sm:$0xff] }
  0x54   :  { %726 = vst [vmem:[#allocation5 + $0x1e8] sm:$0xff] %v598_v7  ;;  %v348_v16 = vmax.f32 %v220_v9, 0.0  ;;  %v349_v17 = vmax.f32 %v221_v10, 0.0  ;;  %v222_v20 = vadd.f32 3.0, %v94_v6  ;;  %v223_v21 = vadd.f32 3.0, %v95_v18  ;;  %v97_v30 = vld [vmem:[#allocation2 + $0x240] sm:$0xff] }
  0x55   :  { %727 = vst [vmem:[#allocation5 + $0x1f0] sm:$0xff] %v599_v11  ;;  %v601_v19 = vmul.f32 0.16666667, %v473_v13  ;;  %v602_v23 = vmul.f32 0.16666667, %v474_v14  ;;  %v475_v24 = vmin.f32 %v347_v15, 6.0 }
  0x56   :  { %728 = vst [vmem:[#allocation5 + $0x1f8] sm:$0xff] %v600_v12  ;;  %v476_v25 = vmin.f32 %v348_v16, 6.0  ;;  %v477_v26 = vmin.f32 %v349_v17, 6.0  ;;  %v350_v27 = vmax.f32 %v222_v20, 0.0  ;;  %v351_v28 = vmax.f32 %v223_v21, 0.0  ;;  %v98_v31 = vld [vmem:[#allocation2 + $0x248] sm:$0xff] }
  0x57   :  { %729 = vst [vmem:[#allocation5 + $0x200] sm:$0xff] %v601_v19  ;;  %v224_v29 = vadd.f32 3.0, %v96_v22  ;;  %v603_v32 = vmul.f32 0.16666667, %v475_v24  ;;  %v225_v34 = vadd.f32 3.0, %v97_v30  ;;  %v99_v39 = vld [vmem:[#allocation2 + $0x250] sm:$0xff] }
  0x58   :  { %730 = vst [vmem:[#allocation5 + $0x208] sm:$0xff] %v602_v23  ;;  %v604_v33 = vmul.f32 0.16666667, %v476_v25  ;;  %v605_v35 = vmul.f32 0.16666667, %v477_v26  ;;  %v478_v36 = vmin.f32 %v350_v27, 6.0 }
  0x59   :  { %v479_v37 = vmin.f32 %v351_v28, 6.0  ;;  %v352_v38 = vmax.f32 %v224_v29, 0.0  ;;  %731 = vst [vmem:[#allocation5 + $0x210] sm:$0xff] %v603_v32  ;;  %v353_v40 = vmax.f32 %v225_v34, 0.0  ;;  %v226_v41 = vadd.f32 3.0, %v98_v31  ;;  %v100_v43 = vld [vmem:[#allocation2 + $0x258] sm:$0xff] }
  0x5a   :  { %v227_v42 = vadd.f32 3.0, %v99_v39  ;;  %v101_v44 = vld [vmem:[#allocation2 + $0x260] sm:$0xff]  ;;  %732 = vst [vmem:[#allocation5 + $0x218] sm:$0xff] %v604_v33  ;;  %v606_v45 = vmul.f32 0.16666667, %v478_v36  ;;  %v228_v51 = vadd.f32 3.0, %v100_v43 }
  0x5b   :  { %v607_v46 = vmul.f32 0.16666667, %v479_v37  ;;  %v480_v47 = vmin.f32 %v352_v38, 6.0  ;;  %733 = vst [vmem:[#allocation5 + $0x220] sm:$0xff] %v605_v35  ;;  %v481_v48 = vmin.f32 %v353_v40, 6.0  ;;  %v354_v49 = vmax.f32 %v226_v41, 0.0 }
  0x5c   :  { %v355_v50 = vmax.f32 %v227_v42, 0.0  ;;  %v102_v52 = vld [vmem:[#allocation2 + $0x268] sm:$0xff]  ;;  %734 = vst [vmem:[#allocation5 + $0x228] sm:$0xff] %v606_v45  ;;  %v229_v54 = vadd.f32 3.0, %v101_v44  ;;  %v103_v56 = vld [vmem:[#allocation2 + $0x270] sm:$0xff]  ;;  %v356_v60 = vmax.f32 %v228_v51, 0.0 }
  0x5d   :  { %v608_v53 = vmul.f32 0.16666667, %v480_v47  ;;  %v230_v55 = vadd.f32 3.0, %v102_v52  ;;  %735 = vst [vmem:[#allocation5 + $0x230] sm:$0xff] %v607_v46  ;;  %v609_v57 = vmul.f32 0.16666667, %v481_v48 }
  0x5e   :  { %v482_v58 = vmin.f32 %v354_v49, 6.0  ;;  %v483_v59 = vmin.f32 %v355_v50, 6.0  ;;  %v357_v61 = vmax.f32 %v229_v54, 0.0  ;;  %v231_v63 = vadd.f32 3.0, %v103_v56  ;;  %v104_v0 = vld [vmem:[#allocation2 + $0x278] sm:$0xff]  ;;  %v105_v1 = vld [vmem:[#allocation2 + $0x280] sm:$0xff] }
  0x5f   :  { %736 = vst [vmem:[#allocation5 + $0x238] sm:$0xff] %v608_v53  ;;  %v358_v62 = vmax.f32 %v230_v55, 0.0  ;;  %v484_v4 = vmin.f32 %v356_v60, 6.0  ;;  %v232_v8 = vadd.f32 3.0, %v104_v0  ;;  %v106_v9 = vld [vmem:[#allocation2 + $0x288] sm:$0xff]  ;;  %v107_v10 = vld [vmem:[#allocation2 + $0x290] sm:$0xff] }
  0x60   :  { %737 = vst [vmem:[#allocation5 + $0x240] sm:$0xff] %v609_v57  ;;  %v610_v2 = vmul.f32 0.16666667, %v482_v58  ;;  %v611_v3 = vmul.f32 0.16666667, %v483_v59  ;;  %v485_v5 = vmin.f32 %v357_v61, 6.0 }
  0x61   :  { %v486_v6 = vmin.f32 %v358_v62, 6.0  ;;  %v359_v7 = vmax.f32 %v231_v63, 0.0  ;;  %v612_v11 = vmul.f32 0.16666667, %v484_v4  ;;  %v233_v12 = vadd.f32 3.0, %v105_v1  ;;  %v108_v22 = vld [vmem:[#allocation2 + $0x298] sm:$0xff] }
  0x62   :  { %738 = vst [vmem:[#allocation5 + $0x248] sm:$0xff] %v610_v2  ;;  %v234_v13 = vadd.f32 3.0, %v106_v9  ;;  %v235_v14 = vadd.f32 3.0, %v107_v10  ;;  %v613_v15 = vmul.f32 0.16666667, %v485_v5  ;;  %v360_v18 = vmax.f32 %v232_v8, 0.0 }
  0x63   :  { %739 = vst [vmem:[#allocation5 + $0x250] sm:$0xff] %v611_v3  ;;  %v614_v16 = vmul.f32 0.16666667, %v486_v6  ;;  %v487_v17 = vmin.f32 %v359_v7, 6.0  ;;  %v361_v19 = vmax.f32 %v233_v12, 0.0  ;;  %v236_v24 = vadd.f32 3.0, %v108_v22 }
  0x64   :  { %740 = vst [vmem:[#allocation5 + $0x258] sm:$0xff] %v612_v11  ;;  %v362_v20 = vmax.f32 %v234_v13, 0.0  ;;  %v363_v21 = vmax.f32 %v235_v14, 0.0  ;;  %v109_v25 = vld [vmem:[#allocation2 + $0x2a0] sm:$0xff]  ;;  %v110_v26 = vld [vmem:[#allocation2 + $0x2a8] sm:$0xff]  ;;  %v488_v27 = vmin.f32 %v360_v18, 6.0 }
  0x65   :  { %741 = vst [vmem:[#allocation5 + $0x260] sm:$0xff] %v613_v15  ;;  %v615_v23 = vmul.f32 0.16666667, %v487_v17  ;;  %v489_v28 = vmin.f32 %v361_v19, 6.0  ;;  %v111_v31 = vld [vmem:[#allocation2 + $0x2b0] sm:$0xff]  ;;  %v364_v32 = vmax.f32 %v236_v24, 0.0 }
  0x66   :  { %742 = vst [vmem:[#allocation5 + $0x268] sm:$0xff] %v614_v16  ;;  %v490_v29 = vmin.f32 %v362_v20, 6.0  ;;  %v491_v30 = vmin.f32 %v363_v21, 6.0  ;;  %v237_v33 = vadd.f32 3.0, %v109_v25  ;;  %v238_v34 = vadd.f32 3.0, %v110_v26  ;;  %v112_v36 = vld [vmem:[#allocation2 + $0x2b8] sm:$0xff] }
  0x67   :  { %743 = vst [vmem:[#allocation5 + $0x270] sm:$0xff] %v615_v23  ;;  %v239_v35 = vadd.f32 3.0, %v111_v31  ;;  %v616_v37 = vmul.f32 0.16666667, %v488_v27  ;;  %v617_v38 = vmul.f32 0.16666667, %v489_v28 }
  0x68   :  { %v618_v39 = vmul.f32 0.16666667, %v490_v29  ;;  %v619_v40 = vmul.f32 0.16666667, %v491_v30  ;;  %v492_v41 = vmin.f32 %v364_v32, 6.0  ;;  %v365_v42 = vmax.f32 %v237_v33, 0.0 }
  0x69   :  { %v366_v43 = vmax.f32 %v238_v34, 0.0  ;;  %v113_v44 = vld [vmem:[#allocation2 + $0x2c0] sm:$0xff]  ;;  %744 = vst [vmem:[#allocation5 + $0x278] sm:$0xff] %v616_v37  ;;  %v367_v45 = vmax.f32 %v239_v35, 0.0  ;;  %v240_v46 = vadd.f32 3.0, %v112_v36  ;;  %v114_v48 = vld [vmem:[#allocation2 + $0x2c8] sm:$0xff] }
  0x6a   :  { %v241_v47 = vadd.f32 3.0, %v113_v44  ;;  %v115_v49 = vld [vmem:[#allocation2 + $0x2d0] sm:$0xff]  ;;  %745 = vst [vmem:[#allocation5 + $0x280] sm:$0xff] %v617_v38  ;;  %v620_v50 = vmul.f32 0.16666667, %v492_v41  ;;  %v493_v51 = vmin.f32 %v365_v42, 6.0 }
  0x6b   :  { %v494_v52 = vmin.f32 %v366_v43, 6.0  ;;  %v242_v53 = vadd.f32 3.0, %v114_v48  ;;  %746 = vst [vmem:[#allocation5 + $0x288] sm:$0xff] %v618_v39  ;;  %v495_v54 = vmin.f32 %v367_v45, 6.0  ;;  %v368_v55 = vmax.f32 %v240_v46, 0.0  ;;  %v116_v58 = vld [vmem:[#allocation2 + $0x2d8] sm:$0xff] }
  0x6c   :  { %v369_v56 = vmax.f32 %v241_v47, 0.0  ;;  %v243_v57 = vadd.f32 3.0, %v115_v49  ;;  %747 = vst [vmem:[#allocation5 + $0x290] sm:$0xff] %v619_v40  ;;  %v621_v59 = vmul.f32 0.16666667, %v493_v51  ;;  %v244_v3 = vadd.f32 3.0, %v116_v58 }
  0x6d   :  { %v622_v60 = vmul.f32 0.16666667, %v494_v52  ;;  %v370_v61 = vmax.f32 %v242_v53, 0.0  ;;  %748 = vst [vmem:[#allocation5 + $0x298] sm:$0xff] %v620_v50  ;;  %v623_v62 = vmul.f32 0.16666667, %v495_v54 }
  0x6e   :  { %v496_v63 = vmin.f32 %v368_v55, 6.0  ;;  %v497_v0 = vmin.f32 %v369_v56, 6.0  ;;  %v371_v1 = vmax.f32 %v243_v57, 0.0  ;;  %749 = vst [vmem:[#allocation5 + $0x2a0] sm:$0xff] %v621_v59  ;;  %v117_v4 = vld [vmem:[#allocation2 + $0x2e0] sm:$0xff]  ;;  %v118_v5 = vld [vmem:[#allocation2 + $0x2e8] sm:$0xff] }
  0x6f   :  { %v498_v2 = vmin.f32 %v370_v61, 6.0  ;;  %v119_v6 = vld [vmem:[#allocation2 + $0x2f0] sm:$0xff]  ;;  %750 = vst [vmem:[#allocation5 + $0x2a8] sm:$0xff] %v622_v60  ;;  %v372_v11 = vmax.f32 %v244_v3, 0.0  ;;  %v245_v12 = vadd.f32 3.0, %v117_v4  ;;  %v246_v13 = vadd.f32 3.0, %v118_v5 }
  0x70   :  { %v624_v7 = vmul.f32 0.16666667, %v496_v63  ;;  %v625_v8 = vmul.f32 0.16666667, %v497_v0  ;;  %v499_v9 = vmin.f32 %v371_v1, 6.0  ;;  %751 = vst [vmem:[#allocation5 + $0x2b0] sm:$0xff] %v623_v62 }
  0x71   :  { %v626_v10 = vmul.f32 0.16666667, %v498_v2  ;;  %v247_v15 = vadd.f32 3.0, %v119_v6  ;;  %v120_v16 = vld [vmem:[#allocation2 + $0x2f8] sm:$0xff]  ;;  %v121_v17 = vld [vmem:[#allocation2 + $0x300] sm:$0xff]  ;;  %v500_v18 = vmin.f32 %v372_v11, 6.0 }
  0x72   :  { %752 = vst [vmem:[#allocation5 + $0x2b8] sm:$0xff] %v624_v7  ;;  %v627_v14 = vmul.f32 0.16666667, %v499_v9  ;;  %v373_v19 = vmax.f32 %v245_v12, 0.0  ;;  %v374_v20 = vmax.f32 %v246_v13, 0.0  ;;  %v248_v21 = vadd.f32 3.0, %v120_v16 }
  0x73   :  { %753 = vst [vmem:[#allocation5 + $0x2c0] sm:$0xff] %v625_v8  ;;  %v122_v22 = vld [vmem:[#allocation2 + $0x308] sm:$0xff]  ;;  %v375_v23 = vmax.f32 %v247_v15, 0.0  ;;  %v249_v24 = vadd.f32 3.0, %v121_v17  ;;  %v123_v26 = vld [vmem:[#allocation2 + $0x310] sm:$0xff]  ;;  %v124_v27 = vld [vmem:[#allocation2 + $0x318] sm:$0xff] }
  0x74   :  { %754 = vst [vmem:[#allocation5 + $0x2c8] sm:$0xff] %v626_v10  ;;  %v250_v25 = vadd.f32 3.0, %v122_v22  ;;  %v628_v28 = vmul.f32 0.16666667, %v500_v18  ;;  %v501_v29 = vmin.f32 %v373_v19, 6.0  ;;  %v502_v30 = vmin.f32 %v374_v20, 6.0 }
  0x75   :  { %755 = vst [vmem:[#allocation5 + $0x2d0] sm:$0xff] %v627_v14  ;;  %v376_v31 = vmax.f32 %v248_v21, 0.0  ;;  %v503_v32 = vmin.f32 %v375_v23, 6.0  ;;  %v377_v33 = vmax.f32 %v249_v24, 0.0  ;;  %v251_v35 = vadd.f32 3.0, %v123_v26  ;;  %v125_v36 = vld [vmem:[#allocation2 + $0x320] sm:$0xff] }
  0x76   :  { %v378_v34 = vmax.f32 %v250_v25, 0.0  ;;  %v126_v37 = vld [vmem:[#allocation2 + $0x328] sm:$0xff]  ;;  %756 = vst [vmem:[#allocation5 + $0x2d8] sm:$0xff] %v628_v28  ;;  %v629_v38 = vmul.f32 0.16666667, %v501_v29  ;;  %v127_v45 = vld [vmem:[#allocation2 + $0x330] sm:$0xff] }
  0x77   :  { %v630_v39 = vmul.f32 0.16666667, %v502_v30  ;;  %v504_v40 = vmin.f32 %v376_v31, 6.0  ;;  %v631_v41 = vmul.f32 0.16666667, %v503_v32  ;;  %v505_v42 = vmin.f32 %v377_v33, 6.0 }
  0x78   :  { %v506_v43 = vmin.f32 %v378_v34, 6.0  ;;  %v379_v44 = vmax.f32 %v251_v35, 0.0  ;;  %757 = vst [vmem:[#allocation5 + $0x2e0] sm:$0xff] %v629_v38  ;;  %v252_v47 = vadd.f32 3.0, %v124_v27  ;;  %v253_v48 = vadd.f32 3.0, %v125_v36  ;;  %v128_v57 = vld [vmem:[#allocation2 + $0x338] sm:$0xff] }
  0x79   :  { %v632_v46 = vmul.f32 0.16666667, %v504_v40  ;;  %v254_v49 = vadd.f32 3.0, %v126_v37  ;;  %758 = vst [vmem:[#allocation5 + $0x2e8] sm:$0xff] %v630_v39  ;;  %v633_v50 = vmul.f32 0.16666667, %v505_v42 }
  0x7a   :  { %v634_v51 = vmul.f32 0.16666667, %v506_v43  ;;  %v507_v52 = vmin.f32 %v379_v44, 6.0  ;;  %759 = vst [vmem:[#allocation5 + $0x2f0] sm:$0xff] %v631_v41  ;;  %v380_v53 = vmax.f32 %v252_v47, 0.0  ;;  %v381_v54 = vmax.f32 %v253_v48, 0.0 }
  0x7b   :  { %v382_v55 = vmax.f32 %v254_v49, 0.0  ;;  %v255_v56 = vadd.f32 3.0, %v127_v45  ;;  %760 = vst [vmem:[#allocation5 + $0x2f8] sm:$0xff] %v632_v46  ;;  %v256_v59 = vadd.f32 3.0, %v128_v57  ;;  %v129_v60 = vld [vmem:[#allocation2 + $0x340] sm:$0xff]  ;;  %v130_v61 = vld [vmem:[#allocation2 + $0x348] sm:$0xff] }
  0x7c   :  { %v635_v58 = vmul.f32 0.16666667, %v507_v52  ;;  %761 = vst [vmem:[#allocation5 + $0x300] sm:$0xff] %v633_v50  ;;  %v508_v62 = vmin.f32 %v380_v53, 6.0  ;;  %v509_v63 = vmin.f32 %v381_v54, 6.0  ;;  %v131_v2 = vld [vmem:[#allocation2 + $0x350] sm:$0xff] }
  0x7d   :  { %v510_v0 = vmin.f32 %v382_v55, 6.0  ;;  %v383_v1 = vmax.f32 %v255_v56, 0.0  ;;  %762 = vst [vmem:[#allocation5 + $0x308] sm:$0xff] %v634_v51  ;;  %v384_v3 = vmax.f32 %v256_v59, 0.0  ;;  %v257_v4 = vadd.f32 3.0, %v129_v60  ;;  %v132_v7 = vld [vmem:[#allocation2 + $0x358] sm:$0xff] }
  0x7e   :  { %v258_v5 = vadd.f32 3.0, %v130_v61  ;;  %v259_v6 = vadd.f32 3.0, %v131_v2  ;;  %763 = vst [vmem:[#allocation5 + $0x310] sm:$0xff] %v635_v58  ;;  %v636_v8 = vmul.f32 0.16666667, %v508_v62  ;;  %v133_v15 = vld [vmem:[#allocation2 + $0x360] sm:$0xff] }
  0x7f   :  { %v637_v9 = vmul.f32 0.16666667, %v509_v63  ;;  %v511_v10 = vmin.f32 %v383_v1, 6.0  ;;  %v638_v11 = vmul.f32 0.16666667, %v510_v0  ;;  %v512_v12 = vmin.f32 %v384_v3, 6.0 }
  0x80   :  { %v385_v13 = vmax.f32 %v257_v4, 0.0  ;;  %v386_v14 = vmax.f32 %v258_v5, 0.0  ;;  %764 = vst [vmem:[#allocation5 + $0x318] sm:$0xff] %v636_v8  ;;  %v387_v17 = vmax.f32 %v259_v6, 0.0  ;;  %v260_v18 = vadd.f32 3.0, %v132_v7  ;;  %v134_v23 = vld [vmem:[#allocation2 + $0x368] sm:$0xff] }
  0x81   :  { %v639_v16 = vmul.f32 0.16666667, %v511_v10  ;;  %v261_v19 = vadd.f32 3.0, %v133_v15  ;;  %765 = vst [vmem:[#allocation5 + $0x320] sm:$0xff] %v637_v9  ;;  %v640_v20 = vmul.f32 0.16666667, %v512_v12 }
  0x82   :  { %v513_v21 = vmin.f32 %v385_v13, 6.0  ;;  %v514_v22 = vmin.f32 %v386_v14, 6.0  ;;  %766 = vst [vmem:[#allocation5 + $0x328] sm:$0xff] %v638_v11  ;;  %v515_v24 = vmin.f32 %v387_v17, 6.0  ;;  %v388_v25 = vmax.f32 %v260_v18, 0.0  ;;  %v135_v28 = vld [vmem:[#allocation2 + $0x370] sm:$0xff] }
  0x83   :  { %v389_v26 = vmax.f32 %v261_v19, 0.0  ;;  %v262_v27 = vadd.f32 3.0, %v134_v23  ;;  %767 = vst [vmem:[#allocation5 + $0x330] sm:$0xff] %v639_v16  ;;  %v263_v31 = vadd.f32 3.0, %v135_v28  ;;  %v136_v37 = vld [vmem:[#allocation2 + $0x378] sm:$0xff]  ;;  %v137_v38 = vld [vmem:[#allocation2 + $0x380] sm:$0xff] }
  0x84   :  { %v641_v29 = vmul.f32 0.16666667, %v513_v21  ;;  %v642_v30 = vmul.f32 0.16666667, %v514_v22  ;;  %768 = vst [vmem:[#allocation5 + $0x338] sm:$0xff] %v640_v20  ;;  %v516_v33 = vmin.f32 %v388_v25, 6.0 }
  0x85   :  { %v643_v32 = vmul.f32 0.16666667, %v515_v24  ;;  %v517_v34 = vmin.f32 %v389_v26, 6.0  ;;  %v390_v35 = vmax.f32 %v262_v27, 0.0  ;;  %v391_v36 = vmax.f32 %v263_v31, 0.0  ;;  %v138_v39 = vld [vmem:[#allocation2 + $0x388] sm:$0xff] }
  0x86   :  { %769 = vst [vmem:[#allocation5 + $0x340] sm:$0xff] %v641_v29  ;;  %v644_v40 = vmul.f32 0.16666667, %v516_v33  ;;  %v264_v44 = vadd.f32 3.0, %v136_v37  ;;  %v265_v45 = vadd.f32 3.0, %v137_v38  ;;  %v266_v46 = vadd.f32 3.0, %v138_v39 }
  0x87   :  { %770 = vst [vmem:[#allocation5 + $0x348] sm:$0xff] %v642_v30  ;;  %v645_v41 = vmul.f32 0.16666667, %v517_v34  ;;  %v518_v42 = vmin.f32 %v390_v35, 6.0  ;;  %v519_v43 = vmin.f32 %v391_v36, 6.0  ;;  %v139_v47 = vld [vmem:[#allocation2 + $0x390] sm:$0xff] }
  0x88   :  { %771 = vst [vmem:[#allocation5 + $0x350] sm:$0xff] %v643_v32  ;;  %v267_v49 = vadd.f32 3.0, %v139_v47  ;;  %v140_v50 = vld [vmem:[#allocation2 + $0x398] sm:$0xff]  ;;  %v141_v51 = vld [vmem:[#allocation2 + $0x3a0] sm:$0xff]  ;;  %v392_v53 = vmax.f32 %v264_v44, 0.0  ;;  %v393_v54 = vmax.f32 %v265_v45, 0.0 }
  0x89   :  { %772 = vst [vmem:[#allocation5 + $0x358] sm:$0xff] %v644_v40  ;;  %v646_v48 = vmul.f32 0.16666667, %v518_v42  ;;  %v647_v52 = vmul.f32 0.16666667, %v519_v43  ;;  %v394_v55 = vmax.f32 %v266_v46, 0.0 }
  0x8a   :  { %773 = vst [vmem:[#allocation5 + $0x360] sm:$0xff] %v645_v41  ;;  %v395_v56 = vmax.f32 %v267_v49, 0.0  ;;  %v268_v57 = vadd.f32 3.0, %v140_v50  ;;  %v269_v58 = vadd.f32 3.0, %v141_v51  ;;  %v142_v59 = vld [vmem:[#allocation2 + $0x3a8] sm:$0xff]  ;;  %v143_v60 = vld [vmem:[#allocation2 + $0x3b0] sm:$0xff] }
  0x8b   :  { %774 = vst [vmem:[#allocation5 + $0x368] sm:$0xff] %v646_v48  ;;  %v520_v61 = vmin.f32 %v392_v53, 6.0  ;;  %v521_v62 = vmin.f32 %v393_v54, 6.0  ;;  %v522_v63 = vmin.f32 %v394_v55, 6.0  ;;  %v270_v0 = vadd.f32 3.0, %v142_v59  ;;  %v144_v1 = vld [vmem:[#allocation2 + $0x3b8] sm:$0xff] }
  0x8c   :  { %775 = vst [vmem:[#allocation5 + $0x370] sm:$0xff] %v647_v52  ;;  %v523_v2 = vmin.f32 %v395_v56, 6.0  ;;  %v396_v3 = vmax.f32 %v268_v57, 0.0  ;;  %v397_v4 = vmax.f32 %v269_v58, 0.0  ;;  %v271_v5 = vadd.f32 3.0, %v143_v60  ;;  %v145_v6 = vld [vmem:[#allocation2 + $0x3c0] sm:$0xff] }
  0x8d   :  { %v146_v7 = vld [vmem:[#allocation2 + $0x3c8] sm:$0xff]  ;;  %v648_v8 = vmul.f32 0.16666667, %v520_v61  ;;  %v649_v9 = vmul.f32 0.16666667, %v521_v62  ;;  %v398_v14 = vmax.f32 %v270_v0, 0.0 }
  0x8e   :  { %v650_v10 = vmul.f32 0.16666667, %v522_v63  ;;  %v651_v11 = vmul.f32 0.16666667, %v523_v2  ;;  %v524_v12 = vmin.f32 %v396_v3, 6.0  ;;  %v525_v13 = vmin.f32 %v397_v4, 6.0 }
  0x8f   :  { %v147_v15 = vld [vmem:[#allocation2 + $0x3d0] sm:$0xff]  ;;  %776 = vst [vmem:[#allocation5 + $0x378] sm:$0xff] %v648_v8  ;;  %v399_v16 = vmax.f32 %v271_v5, 0.0  ;;  %v272_v17 = vadd.f32 3.0, %v144_v1  ;;  %v273_v18 = vadd.f32 3.0, %v145_v6  ;;  %v274_v19 = vadd.f32 3.0, %v146_v7 }
  0x90   :  { %v148_v20 = vld [vmem:[#allocation2 + $0x3d8] sm:$0xff]  ;;  %777 = vst [vmem:[#allocation5 + $0x380] sm:$0xff] %v649_v9  ;;  %v652_v21 = vmul.f32 0.16666667, %v524_v12  ;;  %v653_v22 = vmul.f32 0.16666667, %v525_v13 }
  0x91   :  { %v526_v23 = vmin.f32 %v398_v14, 6.0  ;;  %778 = vst [vmem:[#allocation5 + $0x388] sm:$0xff] %v650_v10  ;;  %v527_v24 = vmin.f32 %v399_v16, 6.0  ;;  %v400_v25 = vmax.f32 %v272_v17, 0.0  ;;  %v401_v26 = vmax.f32 %v273_v18, 0.0  ;;  %v149_v28 = vld [vmem:[#allocation2 + $0x3e0] sm:$0xff] }
  0x92   :  { %v402_v27 = vmax.f32 %v274_v19, 0.0  ;;  %779 = vst [vmem:[#allocation5 + $0x390] sm:$0xff] %v651_v11  ;;  %v275_v30 = vadd.f32 3.0, %v147_v15  ;;  %v276_v31 = vadd.f32 3.0, %v148_v20  ;;  %v277_v32 = vadd.f32 3.0, %v149_v28  ;;  %v150_v40 = vld [vmem:[#allocation2 + $0x3e8] sm:$0xff] }
  0x93   :  { %v654_v29 = vmul.f32 0.16666667, %v526_v23  ;;  %780 = vst [vmem:[#allocation5 + $0x398] sm:$0xff] %v652_v21  ;;  %v655_v33 = vmul.f32 0.16666667, %v527_v24  ;;  %v528_v34 = vmin.f32 %v400_v25, 6.0 }
  0x94   :  { %v529_v35 = vmin.f32 %v401_v26, 6.0  ;;  %v530_v36 = vmin.f32 %v402_v27, 6.0  ;;  %781 = vst [vmem:[#allocation5 + $0x3a0] sm:$0xff] %v653_v22  ;;  %v403_v37 = vmax.f32 %v275_v30, 0.0  ;;  %v404_v38 = vmax.f32 %v276_v31, 0.0  ;;  %v151_v41 = vld [vmem:[#allocation2 + $0x3f0] sm:$0xff] }
  0x95   :  { %v405_v39 = vmax.f32 %v277_v32, 0.0  ;;  %782 = vst [vmem:[#allocation5 + $0x3a8] sm:$0xff] %v654_v29  ;;  %v656_v42 = vmul.f32 0.16666667, %v528_v34  ;;  %v278_v44 = vadd.f32 3.0, %v150_v40  ;;  %v279_v50 = vadd.f32 3.0, %v151_v41 }
  0x96   :  { %v657_v43 = vmul.f32 0.16666667, %v529_v35  ;;  %783 = vst [vmem:[#allocation5 + $0x3b0] sm:$0xff] %v655_v33  ;;  %v658_v45 = vmul.f32 0.16666667, %v530_v36  ;;  %v531_v46 = vmin.f32 %v403_v37, 6.0 }
  0x97   :  { %v532_v47 = vmin.f32 %v404_v38, 6.0  ;;  %v533_v48 = vmin.f32 %v405_v39, 6.0  ;;  %784 = vst [vmem:[#allocation5 + $0x3b8] sm:$0xff] %v656_v42  ;;  %v406_v49 = vmax.f32 %v278_v44, 0.0  ;;  %v152_v51 = vld [vmem:[#allocation2 + $0x3f8] sm:$0xff]  ;;  %v407_v57 = vmax.f32 %v279_v50, 0.0 }
  0x98   :  { %785 = vst [vmem:[#allocation5 + $0x3c0] sm:$0xff] %v657_v43  ;;  %v659_v52 = vmul.f32 0.16666667, %v531_v46  ;;  %v280_v54 = vadd.f32 3.0, %v152_v51 }
  0x99   :  { %v660_v53 = vmul.f32 0.16666667, %v532_v47  ;;  %786 = vst [vmem:[#allocation5 + $0x3c8] sm:$0xff] %v658_v45  ;;  %v661_v55 = vmul.f32 0.16666667, %v533_v48  ;;  %v534_v56 = vmin.f32 %v406_v49, 6.0 }
  0x9a   :  { %787 = vst [vmem:[#allocation5 + $0x3d0] sm:$0xff] %v659_v52  ;;  %v408_v58 = vmax.f32 %v280_v54, 0.0  ;;  %v535_v60 = vmin.f32 %v407_v57, 6.0 }
  0x9b   :  { %788 = vst [vmem:[#allocation5 + $0x3d8] sm:$0xff] %v660_v53  ;;  %v662_v59 = vmul.f32 0.16666667, %v534_v56 }
  0x9c   :  { %789 = vst [vmem:[#allocation5 + $0x3e0] sm:$0xff] %v661_v55  ;;  %v536_v61 = vmin.f32 %v408_v58, 6.0  ;;  %v663_v62 = vmul.f32 0.16666667, %v535_v60 }
  0x9d   :  { %790 = vst [vmem:[#allocation5 + $0x3e8] sm:$0xff] %v662_v59 }
  0x9e   :  { %v664_v63 = vmul.f32 0.16666667, %v536_v61  ;;  %791 = vst [vmem:[#allocation5 + $0x3f0] sm:$0xff] %v663_v62 }
  0xa0   :  { %792 = vst [vmem:[#allocation5 + $0x3f8] sm:$0xff] %v664_v63 }
  0xa1   :  { %805 = dma.vmem_to_hbm [thread:$0]  %s798_s13, 16384, %s800_s16, [#allocation4], %s869_s11, %s869_s11, %s870_s12  }
  0xa2   :  { %866 = dma.done.wait [#allocation4], 16384  }
  0xa3   :  { %867 = vsyncadd [#allocation4], 4294950912 }
  0xa4   :  { %810 = vsyncpa [#allocation3], 1 }
  0xa5   :  { %811 = vsyncpa [#allocation4], 1 }

</bundles_post_ra>
